<compile_context>
chip_gen: v7x
topology: tpu7x:2x2x1
jax: 0.10.0
libtpu: 0.0.40
codegen_flags: <defaults>
</compile_context>

<pallas_src>
import jax
import jax.numpy as jnp
from jax.experimental import pallas as pl
from jax.experimental.pallas import tpu as pltpu


def _qnet_kernel(x_ref, w1_ref, w2_ref, o_ref):
    # hidden = relu(x_aug @ w1_packed)   (bias1 folded into w1 via ones column)
    h = jnp.dot(x_ref[...], w1_ref[...], preferred_element_type=jnp.float32)
    h = jnp.maximum(h, 0.0)
    # out = h @ w2_packed                (bias2 folded via constant-1 hidden unit)
    o = jnp.dot(h.astype(w2_ref.dtype), w2_ref[...],
                preferred_element_type=jnp.float32)
    o_ref[...] = o.astype(o_ref.dtype)


def _round_up(n, m=128):
    return ((n + m - 1) // m) * m


def pack_params(w1, b1, w2, b2, dtype=jnp.float32):
    """Fold biases into lane-padded (128-multiple) weight matrices.

    Returns:
      w1_p: (Inp, Hp) with w1 in the top-left, b1 in row In, and w1_p[In, H]=1
            so hidden column H is a constant-1 unit after ReLU.
      w2_p: (Hp, Op) with w2 in the top-left and b2 in row H.
    """
    In, H = w1.shape
    _, O = w2.shape
    Inp = _round_up(In + 1)   # +1 for the ones column of x
    Hp = _round_up(H + 1)     # +1 for the constant-1 hidden unit
    Op = _round_up(O)

    w1_p = jnp.zeros((Inp, Hp), dtype)
    w1_p = w1_p.at[:In, :H].set(w1.astype(dtype))
    w1_p = w1_p.at[In, :H].set(b1.astype(dtype))
    w1_p = w1_p.at[In, H].set(1.0)          # makes hidden[:, H] == relu(1) == 1

    w2_p = jnp.zeros((Hp, Op), dtype)
    w2_p = w2_p.at[:H, :O].set(w2.astype(dtype))
    w2_p = w2_p.at[H, :O].set(b2.astype(dtype))
    return w1_p, w2_p


def linear_qnet_forward(x, w1, b1, w2, b2, *, block_b=256):
    """x: (B, In) f32; w1: (In, H); b1: (H,); w2: (H, O); b2: (O,)."""
    B, In = x.shape
    O = w2.shape[1]

    w1_p, w2_p = pack_params(w1, b1, w2, b2, dtype=x.dtype)
    Inp, Hp = w1_p.shape
    Op = w2_p.shape[1]

    # Augmented, lane-padded input: [x | 1 | 0 ... 0]
    x_p = jnp.zeros((B, Inp), x.dtype).at[:, :In].set(x).at[:, In].set(1.0)

    if B >= 2 * block_b and B % block_b == 0:
        # Large-batch path: tile batch over a 'parallel' grid axis (weights
        # pinned), so Mosaic can shard across v7x's two TensorCores; neutral
        # on single-TC v5e/v6e.
        out_p = pl.pallas_call(
            _qnet_kernel,
            out_shape=jax.ShapeDtypeStruct((B, Op), x.dtype),
            grid=(B // block_b,),
            in_specs=[
                pl.BlockSpec((block_b, Inp), lambda i: (i, 0)),
                pl.BlockSpec((Inp, Hp), lambda i: (0, 0)),
                pl.BlockSpec((Hp, Op), lambda i: (0, 0)),
            ],
            out_specs=pl.BlockSpec((block_b, Op), lambda i: (i, 0)),
            compiler_params=pltpu.CompilerParams(
                dimension_semantics=("parallel",)),
        )(x_p, w1_p, w2_p)
    else:
        # Small-batch path: gridless call, everything resident in VMEM,
        # no pipeline bookkeeping.
        out_p = pl.pallas_call(
            _qnet_kernel,
            out_shape=jax.ShapeDtypeStruct((B, Op), x.dtype),
            in_specs=[pl.BlockSpec(memory_space=pltpu.MemorySpace.VMEM)] * 3,
            out_specs=pl.BlockSpec(memory_space=pltpu.MemorySpace.VMEM),
        )(x_p, w1_p, w2_p)

    return out_p[:, :O]


def init_params(key, input_size, hidden_size, output_size):
    """Deterministic init mimicking nn.Linear's U(-1/sqrt(fan_in), 1/sqrt(fan_in))."""
    k1, k2, k3, k4 = jax.random.split(key, 4)
    lim1 = 1.0 / jnp.sqrt(input_size)
    lim2 = 1.0 / jnp.sqrt(hidden_size)
    w1 = jax.random.uniform(k1, (input_size, hidden_size), jnp.float32, -lim1, lim1)
    b1 = jax.random.uniform(k2, (hidden_size,), jnp.float32, -lim1, lim1)
    w2 = jax.random.uniform(k3, (hidden_size, output_size), jnp.float32, -lim2, lim2)
    b2 = jax.random.uniform(k4, (output_size,), jnp.float32, -lim2, lim2)
    return w1, b1, w2, b2


if __name__ == "__main__":
    input_size, hidden_size, output_size = 16, 64, 8

    key = jax.random.PRNGKey(0)
    kx, kp, kx2 = jax.random.split(key, 3)
    w1, b1, w2, b2 = init_params(kp, input_size, hidden_size, output_size)

    def ref_fn(xx):
        return jnp.maximum(xx @ w1 + b1, 0.0) @ w2 + b2

    # 1) Small batch -> gridless path
    batch = 8
    x = jax.random.normal(kx, (batch, input_size), dtype=jnp.float32)
    out = jax.block_until_ready(linear_qnet_forward(x, w1, b1, w2, b2))
    assert out.shape == (batch, output_size)
    assert jnp.allclose(out, ref_fn(x), atol=1e-5, rtol=1e-5)

    # 2) Larger batch -> batch-tiled 'parallel' grid path
    batch_big = 512
    x_big = jax.random.normal(kx2, (batch_big, input_size), dtype=jnp.float32)
    out_big = jax.block_until_ready(linear_qnet_forward(x_big, w1, b1, w2, b2))
    assert out_big.shape == (batch_big, output_size)
    assert jnp.allclose(out_big, ref_fn(x_big), atol=1e-5, rtol=1e-5)

    print("KERNEL_OK")
</pallas_src>

<mosaic_0001>
module attributes {stable_mosaic.version = 11 : i64} {
  func.func @_qnet_kernel(%arg0: memref<8x128xf32, #tpu.memory_space<vmem>>, %arg1: memref<128x128xf32, #tpu.memory_space<vmem>>, %arg2: memref<128x128xf32, #tpu.memory_space<vmem>>, %arg3: memref<8x128xf32, #tpu.memory_space<vmem>>) attributes {dimension_semantics = [], scalar_prefetch = 0 : i64, scratch_operands = 0 : i64, tpu.core_type = #tpu.core_type<tc>} {
    %c0 = arith.constant 0 : index
    %c0_0 = arith.constant 0 : index
    %0 = vector.load %arg0[%c0, %c0_0] : memref<8x128xf32, #tpu.memory_space<vmem>>, vector<8x128xf32>
    %c0_1 = arith.constant 0 : index
    %c0_2 = arith.constant 0 : index
    %1 = vector.load %arg1[%c0_1, %c0_2] : memref<128x128xf32, #tpu.memory_space<vmem>>, vector<128x128xf32>
    %cst = arith.constant dense<0.000000e+00> : vector<8x128xf32>
    %2 = tpu.matmul %0, %1, %cst {dimension_numbers = #tpu.dot_dimension_numbers<[1], [0], [0], [1], [0, 0, 1, 1], [], []>} : vector<8x128xf32>, vector<128x128xf32>, vector<8x128xf32> -> vector<8x128xf32>
    %cst_3 = arith.constant 0.000000e+00 : f32
    %3 = vector.broadcast %cst_3 : f32 to vector<8x128xf32>
    %4 = arith.maximumf %2, %3 : vector<8x128xf32>
    %c0_4 = arith.constant 0 : index
    %c0_5 = arith.constant 0 : index
    %5 = vector.load %arg2[%c0_4, %c0_5] : memref<128x128xf32, #tpu.memory_space<vmem>>, vector<128x128xf32>
    %cst_6 = arith.constant dense<0.000000e+00> : vector<8x128xf32>
    %6 = tpu.matmul %4, %5, %cst_6 {dimension_numbers = #tpu.dot_dimension_numbers<[1], [0], [0], [1], [0, 0, 1, 1], [], []>} : vector<8x128xf32>, vector<128x128xf32>, vector<8x128xf32> -> vector<8x128xf32>
    %c0_7 = arith.constant 0 : index
    %c0_8 = arith.constant 0 : index
    %7 = vector.load %arg3[%c0_7, %c0_8] : memref<8x128xf32, #tpu.memory_space<vmem>>, vector<8x128xf32>
    tpu.vector_store %arg3[%c0_7, %c0_8], %6 {strides = array<i32>} : memref<8x128xf32, #tpu.memory_space<vmem>>, vector<8x128xf32>,
    return
  }
}

</mosaic_0001>

<bundles_post_ra>
// kernel: tpu_custom_call.1
= control target key start
LH: loop header
LB: loop body
LE: loop exit
PB: predicated region body
PF: predicated region fallthrough
CT: control target
= control target key end

     0   :  { %8 = vsyncpa [#allocation3], 0  ;;  %s599_s0 = inlined_call_operand.hbm [shape: f32[8,128], index: 0, kind: input, shape index: {}]   ;;  %s600_s1 = inlined_call_operand.hbm [shape: f32[128,128], index: 1, kind: input, shape index: {}]   ;;  %s601_s2 = inlined_call_operand.hbm [shape: f32[128,128], index: 2, kind: input, shape index: {}]   ;;  %s602_s3 = inlined_call_operand.hbm [shape: f32[8,128], index: 3, kind: output, shape index: {}]  }
   0x1   :  { %9 = vsyncpa [#allocation6], 0 }
   0x2   :  { %10 = vsyncpa [#allocation4], 0  ;;  %s500_s12 = smov [#allocation5]   ;;  %s406_s16 = scalar_lea.hbm %s600_s1, 2048 }
   0x3   :  { %s26_s13 = sshll.u32 %s500_s12, 4  ;;  %p407_p0 = scmp.ne.s32.totalorder %s600_s1, %s406_s16  ;;  %s27_s13 = int_to_ptr.vmem [resolvable:$true] %s26_s13 }
   0x4   :  { %p410_p1 = scmp.lt.u32.totalorder %s406_s16, %s600_s1 }
   0x6   :  { %p412_p2 = pnand %p410_p1, %p407_p0 }
   0x8   :  { %415 = shalt.err (!%p412_p2)
}
   0x9   :  { %s416_s21 = scalar_lea.vmem %s27_s13, 2048  ;;  %p421_p4 = scmp.lt.s32.totalorder %s27_s13, %s27_s13 }
   0xa   :  { %p417_p3 = scmp.ne.s32.totalorder %s27_s13, %s416_s21  ;;  %p422_p5 = scmp.lt.s32.totalorder %s416_s21, %s416_s21 }
   0xc   :  { %p423_p6 = por %p422_p5, %p421_p4 }
   0xe   :  { %p424_p7 = pnand %p423_p6, %p417_p3 }
  0x10   :  { %427 = shalt.err (!%p424_p7)
}
  0x11   :  { %s501_s22 = smov 128   ;;  %s502_s23 = smov 8  }
  0x12   :  { %32 = dma.hbm_to_vmem [thread:$0]  %s600_s1, 2048, %s27_s13, [#allocation6], %s501_s22, %s501_s22, %s502_s23  }
  0x13   :  { %s503_s26 = smov [#allocation2]   ;;  %s504_s28 = smov [#allocation7]  }
  0x14   :  { %s17_s27 = sshll.u32 %s503_s26, 4  ;;  %s38_s29 = sshll.u32 %s504_s28, 4  ;;  %s18_s27 = int_to_ptr.vmem [resolvable:$true] %s17_s27  ;;  %s39_s29 = int_to_ptr.vmem [resolvable:$true] %s38_s29 }
  0x15   :  { %s428_s5 = scalar_lea.hbm %s599_s0, 128 }
  0x16   :  { %p429_p8 = scmp.ne.s32.totalorder %s599_s0, %s428_s5  ;;  %p432_p9 = scmp.lt.u32.totalorder %s428_s5, %s599_s0 }
  0x18   :  { %p434_p10 = pnand %p432_p9, %p429_p8 }
  0x1a   :  { %437 = shalt.err (!%p434_p10)
}
  0x1b   :  { %s438_s1 = scalar_lea.vmem %s18_s27, 128  ;;  %p443_p12 = scmp.lt.s32.totalorder %s18_s27, %s18_s27 }
  0x1c   :  { %p439_p11 = scmp.ne.s32.totalorder %s18_s27, %s438_s1  ;;  %p444_p13 = scmp.lt.s32.totalorder %s438_s1, %s438_s1 }
  0x1e   :  { %p445_p0 = por %p444_p13, %p443_p12 }
  0x20   :  { %p446_p1 = pnand %p445_p0, %p439_p11 }
  0x22   :  { %449 = shalt.err (!%p446_p1)
}
  0x23   :  { %20 = dma.hbm_to_vmem [thread:$0]  %s599_s0, 128, %s18_s27, [#allocation3]  }
  0x24   :  { %s450_s14 = scalar_lea.hbm %s601_s2, 2048 }
  0x25   :  { %p451_p2 = scmp.ne.s32.totalorder %s601_s2, %s450_s14  ;;  %p454_p3 = scmp.lt.u32.totalorder %s450_s14, %s601_s2 }
  0x27   :  { %p456_p4 = pnand %p454_p3, %p451_p2 }
  0x29   :  { %459 = shalt.err (!%p456_p4)
}
  0x2a   :  { %s460_s19 = scalar_lea.vmem %s39_s29, 2048  ;;  %p465_p6 = scmp.lt.s32.totalorder %s39_s29, %s39_s29 }
  0x2b   :  { %p461_p5 = scmp.ne.s32.totalorder %s39_s29, %s460_s19  ;;  %p466_p7 = scmp.lt.s32.totalorder %s460_s19, %s460_s19 }
  0x2d   :  { %p467_p8 = por %p466_p7, %p465_p6 }
  0x2f   :  { %p468_p9 = pnand %p467_p8, %p461_p5 }
  0x31   :  { %471 = shalt.err (!%p468_p9)
}
  0x32   :  { %44 = dma.hbm_to_vmem [thread:$0]  %s601_s2, 2048, %s39_s29, [#allocation6], %s501_s22, %s501_s22, %s502_s23  }
  0x33   :  { %494 = dma.done.wait [#allocation3], 128  }
  0x34   :  { %495 = vsyncadd [#allocation3], 4294967168 }
  0x35   :  { %496 = dma.done.wait [#allocation6], 4096  }
  0x36   :  { %497 = vsyncadd [#allocation6], 4294963200  ;;  %v505_v0 = vmov 0.0|0.0   ;;  %vm506_vm0 = vmmov 0   ;;  %v507_v1 = vmov 0.0   ;;  %v55_v2 = vld [vmem:[#allocation5] sm:$0xff] }
  0x37   :  { %349 = vmatprep.subr.bf16.mxu0 %v505_v0  ;;  %311 = vmatprep.mubr.msk.f32.mxu0 %vm506_vm0, %v507_v1  ;;  %v56_v3 = vld [vmem:[#allocation5 + $0x8] sm:$0xff]  ;;  %v57_v4 = vld [vmem:[#allocation5 + $0x10] sm:$0xff]  ;;  %v58_v6 = vld [vmem:[#allocation5 + $0x18] sm:$0xff]  ;;  %s508_s2 = smov [#allocation8]  }
  0x38   :  { %373 = vmatprep.subr.bf16.mxu1 %v505_v0  ;;  %346 = vmatprep.mubr.msk.f32.mxu1 %vm506_vm0, %v507_v1  ;;  %v350_v5 = vpack.c.bf16 %v56_v3, %v55_v2  ;;  %v353_v7 = vpack.c.bf16 %v58_v6, %v57_v4  ;;  %v59_v8 = vld [vmem:[#allocation5 + $0x20] sm:$0xff]  ;;  %v60_v9 = vld [vmem:[#allocation5 + $0x28] sm:$0xff]  ;;  %v144_v12 = vld [vmem:[#allocation7 + $0x10] sm:$0xff]  ;;  %s235_s21 = sshll.u32 %s508_s2, 4  ;;  %s236_s21 = int_to_ptr.vmem [resolvable:$true] %s235_s21 }
  0x39   :  { %v142_v10 = vld [vmem:[#allocation7] sm:$0xff]  ;;  %v143_v11 = vld [vmem:[#allocation7 + $0x8] sm:$0xff]  ;;  %v145_v13 = vld [vmem:[#allocation7 + $0x18] sm:$0xff]  ;;  %v356_v14 = vpack.c.bf16 %v60_v9, %v59_v8  ;;  %s472_s22 = scalar_lea.vmem %s236_s21, 128  ;;  %p477_p11 = scmp.lt.s32.totalorder %s236_s21, %s236_s21 }
  0x3a   :  { %351 = vmatpush3.bf16.msra.mxu0 %v350_v5  ;;  %v374_v15 = vpack.c.bf16 %v143_v11, %v142_v10  ;;  %v61_v16 = vld [vmem:[#allocation5 + $0x30] sm:$0xff]  ;;  %v62_v17 = vld [vmem:[#allocation5 + $0x38] sm:$0xff]  ;;  %v377_v18 = vpack.c.bf16 %v145_v13, %v144_v12  ;;  %v146_v19 = vld [vmem:[#allocation7 + $0x20] sm:$0xff]  ;;  %p473_p10 = scmp.ne.s32.totalorder %s236_s21, %s472_s22  ;;  %p478_p12 = scmp.lt.s32.totalorder %s472_s22, %s472_s22 }
  0x3b   :  { %352 = vmatprep.subr.bf16.mxu0 %v505_v0  ;;  %v147_v20 = vld [vmem:[#allocation7 + $0x28] sm:$0xff]  ;;  %v359_v21 = vpack.c.bf16 %v62_v17, %v61_v16  ;;  %v63_v22 = vld [vmem:[#allocation5 + $0x40] sm:$0xff]  ;;  %v148_v25 = vld [vmem:[#allocation7 + $0x30] sm:$0xff] }
  0x3c   :  { %375 = vmatpush3.bf16.msra.mxu1 %v374_v15  ;;  %v64_v23 = vld [vmem:[#allocation5 + $0x48] sm:$0xff]  ;;  %v380_v24 = vpack.c.bf16 %v147_v20, %v146_v19  ;;  %v149_v26 = vld [vmem:[#allocation7 + $0x38] sm:$0xff]  ;;  %v65_v28 = vld [vmem:[#allocation5 + $0x50] sm:$0xff]  ;;  %p479_p13 = por %p478_p12, %p477_p11 }
  0x3d   :  { %376 = vmatprep.subr.bf16.mxu1 %v505_v0  ;;  %v362_v27 = vpack.c.bf16 %v64_v23, %v63_v22  ;;  %v66_v29 = vld [vmem:[#allocation5 + $0x58] sm:$0xff]  ;;  %v383_v30 = vpack.c.bf16 %v149_v26, %v148_v25  ;;  %v150_v31 = vld [vmem:[#allocation7 + $0x40] sm:$0xff]  ;;  %v151_v32 = vld [vmem:[#allocation7 + $0x48] sm:$0xff] }
  0x3e   :  { %354 = vmatpush3.bf16.msra.mxu0 %v353_v7  ;;  %v365_v33 = vpack.c.bf16 %v66_v29, %v65_v28  ;;  %v67_v34 = vld [vmem:[#allocation5 + $0x60] sm:$0xff]  ;;  %v68_v35 = vld [vmem:[#allocation5 + $0x68] sm:$0xff]  ;;  %v386_v36 = vpack.c.bf16 %v151_v32, %v150_v31  ;;  %v152_v37 = vld [vmem:[#allocation7 + $0x50] sm:$0xff]  ;;  %p480_p0 = pnand %p479_p13, %p473_p10 }
  0x3f   :  { %355 = vmatprep.subr.bf16.mxu0 %v505_v0  ;;  %v153_v38 = vld [vmem:[#allocation7 + $0x58] sm:$0xff]  ;;  %v368_v39 = vpack.c.bf16 %v68_v35, %v67_v34  ;;  %v69_v40 = vld [vmem:[#allocation5 + $0x70] sm:$0xff]  ;;  %v154_v43 = vld [vmem:[#allocation7 + $0x60] sm:$0xff] }
  0x40   :  { %378 = vmatpush3.bf16.msra.mxu1 %v377_v18  ;;  %v70_v41 = vld [vmem:[#allocation5 + $0x78] sm:$0xff]  ;;  %v389_v42 = vpack.c.bf16 %v153_v38, %v152_v37  ;;  %v155_v44 = vld [vmem:[#allocation7 + $0x68] sm:$0xff]  ;;  %v156_v48 = vld [vmem:[#allocation7 + $0x70] sm:$0xff] }
  0x41   :  { %379 = vmatprep.subr.bf16.mxu1 %v505_v0  ;;  %v371_v45 = vpack.c.bf16 %v70_v41, %v69_v40  ;;  %v392_v46 = vpack.c.bf16 %v155_v44, %v154_v43  ;;  %v54_v47 = vld [vmem:[#allocation2] sm:$0xff] }
  0x42   :  { %357 = vmatpush3.bf16.msra.mxu0 %v356_v14  ;;  %v157_v49 = vld [vmem:[#allocation7 + $0x78] sm:$0xff] }
  0x43   :  { %358 = vmatprep.subr.bf16.mxu0 %v505_v0  ;;  %v395_v50 = vpack.c.bf16 %v157_v49, %v156_v48 }
  0x44   :  { %381 = vmatpush3.bf16.msra.mxu1 %v380_v24 }
  0x45   :  { %382 = vmatprep.subr.bf16.mxu1 %v505_v0 }
  0x46   :  { %360 = vmatpush3.bf16.msra.mxu0 %v359_v21 }
  0x47   :  { %361 = vmatprep.subr.bf16.mxu0 %v505_v0 }
  0x48   :  { %384 = vmatpush3.bf16.msra.mxu1 %v383_v30 }
  0x49   :  { %385 = vmatprep.subr.bf16.mxu1 %v505_v0 }
  0x4a   :  { %363 = vmatpush3.bf16.msra.mxu0 %v362_v27 }
  0x4b   :  { %364 = vmatprep.subr.bf16.mxu0 %v505_v0 }
  0x4c   :  { %387 = vmatpush3.bf16.msra.mxu1 %v386_v36 }
  0x4d   :  { %388 = vmatprep.subr.bf16.mxu1 %v505_v0 }
  0x4e   :  { %366 = vmatpush3.bf16.msra.mxu0 %v365_v33 }
  0x4f   :  { %367 = vmatprep.subr.bf16.mxu0 %v505_v0 }
  0x50   :  { %390 = vmatpush3.bf16.msra.mxu1 %v389_v42 }
  0x51   :  { %391 = vmatprep.subr.bf16.mxu1 %v505_v0 }
  0x52   :  { %369 = vmatpush3.bf16.msra.mxu0 %v368_v39 }
  0x53   :  { %370 = vmatprep.subr.bf16.mxu0 %v505_v0 }
  0x54   :  { %393 = vmatpush3.bf16.msra.mxu1 %v392_v46 }
  0x55   :  { %394 = vmatprep.subr.bf16.mxu1 %v505_v0 }
  0x56   :  { %372 = vmatpush3.bf16.msra.mxu0 %v371_v45 }
  0x58   :  { %396 = vmatpush3.bf16.msra.mxu1 %v395_v50 }
  0x59   :  { %312 = vmatmul.mubr.f32.vlgmr.msra.gmra.mrb[0].mxu0 %v54_v47 }
 0x12c   :  { %v137_v51 = vpop.f32.mrb[0].mxu0 }
 0x12d   :  { %v141_v52 = vmax.f32 %v137_v51, 0.0  ;;  %v313_v53 = vpop.f32.mrb[1].mxu0 }
 0x12f   :  { %347 = vmatmul.mubr.f32.vlgmr.msra.gmra.mrb[0].mxu1 %v141_v52 }
 0x202   :  { %v224_v54 = vpop.f32.mrb[0].mxu1 }
 0x203   :  { %228 = vst [vmem:[#allocation8] sm:$0xff] %v224_v54  ;;  %v348_v55 = vpop.f32.mrb[1].mxu1 }
 0x204   :  { %483 = shalt.err (!%p480_p0)
}
 0x205   :  { %s484_s25 = scalar_lea.hbm %s602_s3, 128 }
 0x206   :  { %p485_p1 = scmp.ne.s32.totalorder %s602_s3, %s484_s25  ;;  %p488_p2 = scmp.lt.u32.totalorder %s484_s25, %s602_s3 }
 0x208   :  { %p490_p3 = pnand %p488_p2, %p485_p1 }
 0x20a   :  { %493 = shalt.err (!%p490_p3)
}
 0x20b   :  { %238 = dma.vmem_to_hbm [thread:$0]  %s236_s21, 128, %s602_s3, [#allocation4]  }
 0x20c   :  { %498 = dma.done.wait [#allocation4], 128  }
 0x20d   :  { %499 = vsyncadd [#allocation4], 4294967168 }
 0x20e   :  { %242 = vsyncpa [#allocation3], 1 }
 0x20f   :  { %243 = vsyncpa [#allocation6], 1 }
 0x210   :  { %244 = vsyncpa [#allocation4], 1 }

</bundles_post_ra>
